<compile_context>
chip_gen: v6e
topology: v6e:2x2x1
jax: 0.10.0
libtpu: 0.0.40
codegen_flags: <defaults>
</compile_context>

<pallas_src>
import math
import functools

import jax
import jax.numpy as jnp
import numpy as np
from jax.experimental import pallas as pl
from jax.experimental.pallas import tpu as pltpu

# ---------------- model hyperparameters ----------------
BATCH = 256                # example batch (2-step grid -> exercises pipelining / megacore)
INPUT_DIM = 32
OUTPUT_DIM = 32
CODEBOOK_SIZE = 4          # m  -> codebook weight has shape (m-1, 2)
INITIAL_C = 5.0            # ci

HID1 = math.floor(0.5 * INPUT_DIM)   # 16  (quantization layer dimension)
HID2 = math.floor(2.0 * HID1)        # 32
# final linear: HID2 -> OUTPUT_DIM (last numeric architecture entry)

LANE = 128
TB_CAP = 4096              # lane-tile cap: keeps per-step VMEM footprint ~2-3 MiB


def _round_up(x, m):
    return ((x + m - 1) // m) * m


def _plan_batch(B, tb_cap=TB_CAP):
    """Pick the lane-tile size (multiple of 128) and padded batch.

    Aims for >=2 grid steps (v7x megacore) while keeping tiles large enough to
    amortize per-step overhead; caps the tile for v5e's scoped-VMEM default.
    """
    if B <= LANE:
        return LANE, LANE
    tb = min(_round_up((B + 1) // 2, LANE), tb_cap)
    padded_b = _round_up(B, tb)
    return tb, padded_b


# ---------------- Pallas kernel (batch on lanes) ----------------
def network_kernel(qw_ref,            # SMEM (2*(m-1),): interleaved [a_k, c*b_k]
                   xt_ref,            # VMEM (INPUT_DIM, TB)
                   w1_ref, b1_ref,    # VMEM (HID1, INPUT_DIM), (HID1, 1)   [c-folded]
                   w2_ref, b2_ref,    # VMEM (HID2, HID1),      (HID2, 1)
                   w3_ref, b3_ref,    # VMEM (OUTPUT_DIM, HID2),(OUTPUT_DIM, 1)
                   ot_ref,            # VMEM (OUTPUT_DIM, TB)
                   *, codebook_size):
    # Linear(32,16) + relu, with c already folded into w1/b1:
    #   hc = relu((c*W1) x + c*b1) = c * relu(W1 x + b1)
    hc = jnp.dot(w1_ref[...], xt_ref[...], preferred_element_type=jnp.float32)
    hc = jnp.maximum(hc + b1_ref[...], 0.0)                    # (HID1, TB)

    # QuantizationLayer: ret = sum_k a_k * tanh(c*(h + b_k)) = sum_k a_k * tanh(hc + c*b_k)
    # Scalars a_k and c*b_k come straight from SMEM; tanh lands on the EUP slot.
    q = jnp.zeros_like(hc)
    for kk in range(codebook_size - 1):                        # static, small unrolled loop
        a_k = qw_ref[2 * kk]
        cb_k = qw_ref[2 * kk + 1]
        q = q + a_k * jnp.tanh(hc + cb_k)

    # Linear(16,32) + relu
    h2 = jnp.dot(w2_ref[...], q, preferred_element_type=jnp.float32)
    h2 = jnp.maximum(h2 + b2_ref[...], 0.0)                    # (HID2, TB)

    # Linear(32,32); lane-dense (TB-wide) output store.
    o = jnp.dot(w3_ref[...], h2, preferred_element_type=jnp.float32)
    ot_ref[...] = o + b3_ref[...]


def prepare_params(params, c=INITIAL_C):
    """One-time transform of module params into kernel-ready form.

    - weights kept in PyTorch (out_features, in_features) layout (batch-on-lanes matmul)
    - c folded into Linear1 (valid since relu is positively homogeneous and c > 0)
    - codebook flattened and pre-scaled to interleaved [a_k, c*b_k] for SMEM
    """
    qw, w1, b1, w2, b2, w3, b3 = params
    qw_flat = (qw * jnp.array([1.0, c], jnp.float32)).reshape(-1)
    return (qw_flat, c * w1, c * b1, w2, b2, w3, b3)


def network_forward(x, prepared_params, *, tb_cap=TB_CAP):
    """x: (B, INPUT_DIM) f32 -> (B, OUTPUT_DIM) f32.

    Internally runs batch-on-lanes: xT (INPUT_DIM, B) tiled over a 1-D
    'parallel' grid along the lane (batch) axis.
    """
    qw_flat, w1c, b1c, w2, b2, w3, b3 = prepared_params

    B = x.shape[0]
    tb, padded_b = _plan_batch(B, tb_cap)
    grid = (padded_b // tb,)

    xt = x.T                                                   # (INPUT_DIM, B)
    if padded_b != B:
        xt = jnp.pad(xt, ((0, 0), (0, padded_b - B)))

    # Weights/biases: constant index_map -> block index never changes, so the
    # pipeline keeps them resident in VMEM across grid steps.
    resident = lambda shape: pl.BlockSpec(shape, lambda i: (0, 0))

    kernel = functools.partial(network_kernel, codebook_size=CODEBOOK_SIZE)
    out_t = pl.pallas_call(
        kernel,
        out_shape=jax.ShapeDtypeStruct((OUTPUT_DIM, padded_b), jnp.float32),
        grid=grid,
        in_specs=[
            pl.BlockSpec(memory_space=pltpu.MemorySpace.SMEM),     # codebook
            pl.BlockSpec((INPUT_DIM, tb), lambda i: (0, i)),       # xT tile
            resident((HID1, INPUT_DIM)),                           # c*w1
            resident((HID1, 1)),                                   # c*b1
            resident((HID2, HID1)),                                # w2
            resident((HID2, 1)),                                   # b2
            resident((OUTPUT_DIM, HID2)),                          # w3
            resident((OUTPUT_DIM, 1)),                             # b3
        ],
        out_specs=pl.BlockSpec((OUTPUT_DIM, tb), lambda i: (0, i)),
        compiler_params=pltpu.CompilerParams(
            dimension_semantics=("parallel",)),                    # megacore on v7x
    )(qw_flat, xt, w1c, b1c, w2, b2, w3, b3)

    if padded_b != B:
        out_t = out_t[:, :B]
    return out_t.T


# ---------------- deterministic parameter init (mimics nn.Linear / reset_parameters) ----
def init_params(key):
    ks = jax.random.split(key, 7)

    def linear_init(kw, kb, fan_in, fan_out):
        bound = 1.0 / math.sqrt(fan_in)
        w = jax.random.uniform(kw, (fan_out, fan_in), jnp.float32, -bound, bound)
        b = jax.random.uniform(kb, (fan_out, 1), jnp.float32, -bound, bound)
        return w, b

    w1, b1 = linear_init(ks[0], ks[1], INPUT_DIM, HID1)
    w2, b2 = linear_init(ks[2], ks[3], HID1, HID2)
    w3, b3 = linear_init(ks[4], ks[5], HID2, OUTPUT_DIM)

    q_std = 1.0 / math.sqrt((CODEBOOK_SIZE - 1) * 2)
    qw = jax.random.uniform(ks[6], (CODEBOOK_SIZE - 1, 2), jnp.float32,
                            -q_std, q_std)
    return qw, w1, b1, w2, b2, w3, b3


# ---------------- pure-JAX reference (for the correctness check) ----------------
def reference_forward(x, params):
    qw, w1, b1, w2, b2, w3, b3 = params
    h = jnp.maximum(x @ w1.T + b1.T, 0.0)
    q = jnp.zeros_like(h)
    for kk in range(CODEBOOK_SIZE - 1):
        q = q + qw[kk, 0] * jnp.tanh((h + qw[kk, 1]) * INITIAL_C)
    h2 = jnp.maximum(q @ w2.T + b2.T, 0.0)
    return h2 @ w3.T + b3.T


if __name__ == "__main__":
    key = jax.random.PRNGKey(0)
    kx, kp = jax.random.split(key)
    x = jax.random.normal(kx, (BATCH, INPUT_DIM), jnp.float32)
    params = init_params(kp)
    prepared = prepare_params(params)   # one-time param transform (c fold, codebook prescale)

    out = network_forward(x, prepared)
    out = jax.block_until_ready(out)

    ref = reference_forward(x, params)
    np.testing.assert_allclose(np.asarray(out), np.asarray(ref),
                               rtol=1e-5, atol=1e-5)
    print("KERNEL_OK")
</pallas_src>

<mosaic_0001>
module attributes {stable_mosaic.version = 11 : i64} {
  func.func @network_kernel(%arg0: i32, %arg1: memref<6xf32, #tpu.memory_space<smem>>, %arg2: memref<32x128xf32, #tpu.memory_space<vmem>>, %arg3: memref<16x32xf32, #tpu.memory_space<vmem>>, %arg4: memref<16x1xf32, #tpu.memory_space<vmem>>, %arg5: memref<32x16xf32, #tpu.memory_space<vmem>>, %arg6: memref<32x1xf32, #tpu.memory_space<vmem>>, %arg7: memref<32x32xf32, #tpu.memory_space<vmem>>, %arg8: memref<32x1xf32, #tpu.memory_space<vmem>>, %arg9: memref<32x128xf32, #tpu.memory_space<vmem>>) attributes {dimension_semantics = [#tpu.dimension_semantics<parallel>], iteration_bounds = array<i64: 2>, scalar_prefetch = 0 : i64, scratch_operands = 0 : i64, tpu.core_type = #tpu.core_type<tc>, window_params = [{transform_indices = @transform_0, window_bounds = array<i64: 6>}, {transform_indices = @transform_1, window_bounds = array<i64: 32, 128>}, {pipeline_mode = #tpu.pipeline_mode<synchronous>, transform_indices = @transform_2, window_bounds = array<i64: 16, 32>}, {pipeline_mode = #tpu.pipeline_mode<synchronous>, transform_indices = @transform_3, window_bounds = array<i64: 16, 1>}, {pipeline_mode = #tpu.pipeline_mode<synchronous>, transform_indices = @transform_4, window_bounds = array<i64: 32, 16>}, {pipeline_mode = #tpu.pipeline_mode<synchronous>, transform_indices = @transform_5, window_bounds = array<i64: 32, 1>}, {pipeline_mode = #tpu.pipeline_mode<synchronous>, transform_indices = @transform_6, window_bounds = array<i64: 32, 32>}, {pipeline_mode = #tpu.pipeline_mode<synchronous>, transform_indices = @transform_7, window_bounds = array<i64: 32, 1>}, {transform_indices = @transform_8, window_bounds = array<i64: 32, 128>}]} {
    %c0 = arith.constant 0 : index
    %c0_0 = arith.constant 0 : index
    %0 = vector.load %arg3[%c0, %c0_0] : memref<16x32xf32, #tpu.memory_space<vmem>>, vector<16x32xf32>
    %c0_1 = arith.constant 0 : index
    %c0_2 = arith.constant 0 : index
    %1 = vector.load %arg2[%c0_1, %c0_2] : memref<32x128xf32, #tpu.memory_space<vmem>>, vector<32x128xf32>
    %cst = arith.constant dense<0.000000e+00> : vector<16x128xf32>
    %2 = tpu.matmul %0, %1, %cst {dimension_numbers = #tpu.dot_dimension_numbers<[1], [0], [0], [1], [0, 0, 1, 1], [], []>} : vector<16x32xf32>, vector<32x128xf32>, vector<16x128xf32> -> vector<16x128xf32>
    %c0_3 = arith.constant 0 : index
    %c0_4 = arith.constant 0 : index
    %3 = vector.load %arg4[%c0_3, %c0_4] : memref<16x1xf32, #tpu.memory_space<vmem>>, vector<16x1xf32>
    %4 = vector.broadcast %3 : vector<16x1xf32> to vector<16x128xf32>
    %5 = arith.addf %2, %4 : vector<16x128xf32>
    %cst_5 = arith.constant 0.000000e+00 : f32
    %6 = vector.broadcast %cst_5 : f32 to vector<16x128xf32>
    %7 = arith.maximumf %5, %6 : vector<16x128xf32>
    %cst_6 = arith.constant 0.000000e+00 : f32
    %8 = vector.broadcast %cst_6 : f32 to vector<16x128xf32>
    %c0_7 = arith.constant 0 : index
    %9 = memref.load %arg1[%c0_7] : memref<6xf32, #tpu.memory_space<smem>>
    %c1 = arith.constant 1 : index
    %10 = memref.load %arg1[%c1] : memref<6xf32, #tpu.memory_space<smem>>
    %11 = vector.broadcast %10 : f32 to vector<16x128xf32>
    %12 = arith.addf %7, %11 : vector<16x128xf32>
    %13 = math.tanh %12 : vector<16x128xf32>
    %14 = vector.broadcast %9 : f32 to vector<16x128xf32>
    %15 = arith.mulf %14, %13 : vector<16x128xf32>
    %16 = arith.addf %8, %15 : vector<16x128xf32>
    %c2 = arith.constant 2 : index
    %17 = memref.load %arg1[%c2] : memref<6xf32, #tpu.memory_space<smem>>
    %c3 = arith.constant 3 : index
    %18 = memref.load %arg1[%c3] : memref<6xf32, #tpu.memory_space<smem>>
    %19 = vector.broadcast %18 : f32 to vector<16x128xf32>
    %20 = arith.addf %7, %19 : vector<16x128xf32>
    %21 = math.tanh %20 : vector<16x128xf32>
    %22 = vector.broadcast %17 : f32 to vector<16x128xf32>
    %23 = arith.mulf %22, %21 : vector<16x128xf32>
    %24 = arith.addf %16, %23 : vector<16x128xf32>
    %c4 = arith.constant 4 : index
    %25 = memref.load %arg1[%c4] : memref<6xf32, #tpu.memory_space<smem>>
    %c5 = arith.constant 5 : index
    %26 = memref.load %arg1[%c5] : memref<6xf32, #tpu.memory_space<smem>>
    %27 = vector.broadcast %26 : f32 to vector<16x128xf32>
    %28 = arith.addf %7, %27 : vector<16x128xf32>
    %29 = math.tanh %28 : vector<16x128xf32>
    %30 = vector.broadcast %25 : f32 to vector<16x128xf32>
    %31 = arith.mulf %30, %29 : vector<16x128xf32>
    %32 = arith.addf %24, %31 : vector<16x128xf32>
    %c0_8 = arith.constant 0 : index
    %c0_9 = arith.constant 0 : index
    %33 = vector.load %arg5[%c0_8, %c0_9] : memref<32x16xf32, #tpu.memory_space<vmem>>, vector<32x16xf32>
    %cst_10 = arith.constant dense<0.000000e+00> : vector<32x128xf32>
    %34 = tpu.matmul %33, %32, %cst_10 {dimension_numbers = #tpu.dot_dimension_numbers<[1], [0], [0], [1], [0, 0, 1, 1], [], []>} : vector<32x16xf32>, vector<16x128xf32>, vector<32x128xf32> -> vector<32x128xf32>
    %c0_11 = arith.constant 0 : index
    %c0_12 = arith.constant 0 : index
    %35 = vector.load %arg6[%c0_11, %c0_12] : memref<32x1xf32, #tpu.memory_space<vmem>>, vector<32x1xf32>
    %36 = vector.broadcast %35 : vector<32x1xf32> to vector<32x128xf32>
    %37 = arith.addf %34, %36 : vector<32x128xf32>
    %cst_13 = arith.constant 0.000000e+00 : f32
    %38 = vector.broadcast %cst_13 : f32 to vector<32x128xf32>
    %39 = arith.maximumf %37, %38 : vector<32x128xf32>
    %c0_14 = arith.constant 0 : index
    %c0_15 = arith.constant 0 : index
    %40 = vector.load %arg7[%c0_14, %c0_15] : memref<32x32xf32, #tpu.memory_space<vmem>>, vector<32x32xf32>
    %cst_16 = arith.constant dense<0.000000e+00> : vector<32x128xf32>
    %41 = tpu.matmul %40, %39, %cst_16 {dimension_numbers = #tpu.dot_dimension_numbers<[1], [0], [0], [1], [0, 0, 1, 1], [], []>} : vector<32x32xf32>, vector<32x128xf32>, vector<32x128xf32> -> vector<32x128xf32>
    %c0_17 = arith.constant 0 : index
    %c0_18 = arith.constant 0 : index
    %42 = vector.load %arg8[%c0_17, %c0_18] : memref<32x1xf32, #tpu.memory_space<vmem>>, vector<32x1xf32>
    %43 = vector.broadcast %42 : vector<32x1xf32> to vector<32x128xf32>
    %44 = arith.addf %41, %43 : vector<32x128xf32>
    %c0_19 = arith.constant 0 : index
    %c0_20 = arith.constant 0 : index
    %45 = vector.load %arg9[%c0_19, %c0_20] : memref<32x128xf32, #tpu.memory_space<vmem>>, vector<32x128xf32>
    tpu.vector_store %arg9[%c0_19, %c0_20], %44 {strides = array<i32>} : memref<32x128xf32, #tpu.memory_space<vmem>>, vector<32x128xf32>,
    return
  }
  func.func @transform_0(%arg0: i32) -> i32 {
    %c0_i32 = arith.constant 0 : i32
    %c0_i32_0 = arith.constant 0 : i32
    return %c0_i32 : i32
  }
  func.func @transform_1(%arg0: i32) -> (i32, i32) {
    %c0_i32 = arith.constant 0 : i32
    %c0_i32_0 = arith.constant 0 : i32
    return %c0_i32, %arg0 : i32, i32
  }
  func.func @transform_2(%arg0: i32) -> (i32, i32) {
    %c0_i32 = arith.constant 0 : i32
    %c0_i32_0 = arith.constant 0 : i32
    %c0_i32_1 = arith.constant 0 : i32
    return %c0_i32, %c0_i32_0 : i32, i32
  }
  func.func @transform_3(%arg0: i32) -> (i32, i32) {
    %c0_i32 = arith.constant 0 : i32
    %c0_i32_0 = arith.constant 0 : i32
    %c0_i32_1 = arith.constant 0 : i32
    return %c0_i32, %c0_i32_0 : i32, i32
  }
  func.func @transform_4(%arg0: i32) -> (i32, i32) {
    %c0_i32 = arith.constant 0 : i32
    %c0_i32_0 = arith.constant 0 : i32
    %c0_i32_1 = arith.constant 0 : i32
    return %c0_i32, %c0_i32_0 : i32, i32
  }
  func.func @transform_5(%arg0: i32) -> (i32, i32) {
    %c0_i32 = arith.constant 0 : i32
    %c0_i32_0 = arith.constant 0 : i32
    %c0_i32_1 = arith.constant 0 : i32
    return %c0_i32, %c0_i32_0 : i32, i32
  }
  func.func @transform_6(%arg0: i32) -> (i32, i32) {
    %c0_i32 = arith.constant 0 : i32
    %c0_i32_0 = arith.constant 0 : i32
    %c0_i32_1 = arith.constant 0 : i32
    return %c0_i32, %c0_i32_0 : i32, i32
  }
  func.func @transform_7(%arg0: i32) -> (i32, i32) {
    %c0_i32 = arith.constant 0 : i32
    %c0_i32_0 = arith.constant 0 : i32
    %c0_i32_1 = arith.constant 0 : i32
    return %c0_i32, %c0_i32_0 : i32, i32
  }
  func.func @transform_8(%arg0: i32) -> (i32, i32) {
    %c0_i32 = arith.constant 0 : i32
    %c0_i32_0 = arith.constant 0 : i32
    return %c0_i32, %arg0 : i32, i32
  }
}

</mosaic_0001>

<bundles_post_ra>
// kernel: tpu_custom_call.1
= control target key start
LH: loop header
LB: loop body
LE: loop exit
PB: predicated region body
PF: predicated region fallthrough
CT: control target
= control target key end

     0   :  { %13 = vsyncpa [#allocation4], 0  ;;  %s1348_s0 = inlined_call_operand.vmem [shape: f32[6], index: 0, kind: input, shape index: {}]   ;;  %s1349_s1 = inlined_call_operand.vmem [shape: f32[32,256], index: 1, kind: input, shape index: {}]   ;;  %s1350_s2 = inlined_call_operand.vmem [shape: f32[16,32], index: 2, kind: input, shape index: {}]   ;;  %s1351_s3 = inlined_call_operand.vmem [shape: f32[16,1], index: 3, kind: input, shape index: {}]   ;;  %s1352_s4 = inlined_call_operand.vmem [shape: f32[32,16], index: 4, kind: input, shape index: {}]   ;;  %s1353_s5 = inlined_call_operand.vmem [shape: f32[32,1], index: 5, kind: input, shape index: {}]   ;;  %s1354_s6 = inlined_call_operand.vmem [shape: f32[32,32], index: 6, kind: input, shape index: {}]   ;;  %s1355_s7 = inlined_call_operand.vmem [shape: f32[32,1], index: 7, kind: input, shape index: {}]   ;;  %s1356_s8 = inlined_call_operand.hbm [shape: f32[32,256], index: 8, kind: output, shape index: {}]  }
   0x1   :  { %14 = vsyncpa [#allocation3], 0 }
   0x2   :  { %16 = vsyncpa [#allocation3 + $0x1], 0  ;;  %s1139_s27 = smov 0   ;;  %s1141_s28 = smov 0  }
   0x3   :  { %s1143_s29 = smov 0   ;;  %s1145_s30 = smov 0  }
   0x4 LB: > { %s1160_s9 = sadd.s32 4294967295, %s1086_s30   ;;  %s855_s10 = sadd.s32 4294967294, %s1086_s30   ;;  %s1086_s30 = sphi %s1145_s30, %s1367_s30   ;;  %s1082_s29 = sphi %s1143_s29, %s1366_s29   ;;  %s1078_s28 = sphi %s1141_s28, %s1365_s28   ;;  %s1074_s27 = sphi %s1139_s27, %s1364_s27  }
   0x5   : > { %s1164_s11 = sadd.s32 1, %s1086_s30   ;;  %s50_s12 = sadd.s32 1, %s1082_s29 }
   0x6   : > { %s47_s13 = ssub.s32 %s1086_s30, %s1164_s11  ;;  %p57_p0 = scmp.ne.s32.totalorder %s1082_s29, %s1078_s28 }
   0x7   : > { %p48_p1 = scmp.eq.s32.totalorder %s47_s13, 0  ;;  %p58_p2 = scmp.eq.s32.totalorder %s1086_s30, 0 }
   0x8   : > { %p213_p3 = scmp.eq.s32.totalorder %s1160_s9, 1  ;;  %p218_p4 = scmp.ne.s32.totalorder %s1078_s28, %s1074_s27 }
   0x9   : > { %s1176_s14 = scalar_select %p48_p1, %s1082_s29, %s50_s12  }
   0xa   : > { %p1178_p5 = por %p58_p2, %p57_p0  ;;  %p1182_p6 = por %p213_p3, %p57_p0 }
   0xb   : > { %p219_p7 = scmp.eq.s32.totalorder %s855_s10, 1  ;;  %p856_p8 = scmp.ge.s32.totalorder %s1086_s30, 1 }
   0xc   : > { %s1359_s16 = scalar_select %p1182_p6, 1, 0 }
   0xd   : > { %p226_p9 = scmp.lt.s32.totalorder %s1086_s30, 3  ;;  %p1188_p10 = por %p219_p7, %p218_p4 }
   0xe   : > { %p953_p11 = scmp.eq.s32.totalorder %s1160_s9, 0  ;;  %s239_s21 = sshll.u32 %s1348_s0, 4  ;;  %s240_s21 = int_to_ptr.vmem [resolvable:$true] %s239_s21 }
   0xf   : > { %s1360_s17 = scalar_select %p1188_p10, 1, 0 }
  0x10   : > { %p1193_p12 = pnand %p856_p8, %p226_p9  ;;  %s1007_s22 = scalar_lea.vmem %s240_s21, 16 }
  0x11   : > { %p1008_p1 = scmp.ne.s32.totalorder %s240_s21, %s1007_s22  ;;  %p1015_p7 = scmp.lt.s32.totalorder %s240_s21, %s240_s21 }
  0x12   : > { %p945_p13 = pneg %p1193_p12  ;;  %p1016_p8 = scmp.lt.s32.totalorder %s1007_s22, %s1007_s22 }
  0x14   : > { %p946_p0 = pnand %p953_p11, %p945_p13  ;;  %p1017_p9 = por %p1016_p8, %p1015_p7 }
  0x16   : > { %p1009_p2 = pneg %p946_p0 }
  0x18   : > { %p1010_p3 = pnand %p1009_p2, %p1008_p1 }
  0x1a   : > { %p1011_p4 = pneg %p1010_p3 }
  0x1c   : > { %p1018_p10 = pnand %p1017_p9, %p1011_p4 }
  0x1e   : > { %1021 = shalt.err (!%p1018_p10)
}
  0x1f   : > { %s1088_s23 = smov [#allocation2]   ;;  %p858_p6 = scmp.ge.s32.totalorder %s1086_s30, 2 }
  0x20   : > { %948 = dma.vmem_to_smem (!%p946_p0), %s240_s21, 16, %s1088_s23, [#allocation4]  }
  0x21   : > { %264 = sbr.rel (%p858_p6) target bundleno = 44 (0x2c), region = 44 }
  0x26   : > { %267 = sbr.rel (!%p1178_p5) target bundleno = 44 (0x2c), region = 48  ;;  %s269_s24 = sand.u32 (%p1178_p5), 1, %s1082_s29  }
  0x27   : > { %s860_s25 = sshll.u32 (%p1178_p5), %s1086_s30, 3  ;;  %s859_s26 = sshll.u32 (%p1178_p5), %s269_s24, 5 }
  0x28   : > { %s273_s13 = scalar_lea.vmem (%p1178_p5), %s1349_s1, %s860_s25  ;;  %s271_s19 = scalar_lea.vmem (%p1178_p5), [#allocation5], %s859_s26 }
  0x29   : > { %v308_v0 = vld [vmem:[%s273_s13] sm:$0xff] (%p1178_p5)  ;;  %v310_v1 = vld [vmem:[%s273_s13 + $0x10] sm:$0xff] (%p1178_p5) }
  0x2a   : > { %v312_v2 = vld [vmem:[%s273_s13 + $0x20] sm:$0xff] (%p1178_p5)  ;;  %309 = vst [vmem:[%s271_s19] sm:$0xff] (%p1178_p5), %v308_v0  ;;  %311 = vst [vmem:[%s271_s19 + $0x8] sm:$0xff] (%p1178_p5), %v310_v1  ;;  %v314_v3 = vld [vmem:[%s273_s13 + $0x30] sm:$0xff] (%p1178_p5) }
  0x2b   : > { %313 = vst [vmem:[%s271_s19 + $0x10] sm:$0xff] %v312_v2  ;;  %315 = vst [vmem:[%s271_s19 + $0x18] sm:$0xff] %v314_v3 }
  0x2c PF: > { %324 = sbr.rel (%p1193_p12) target bundleno = 713 (0x2c9), region = 86 }
  0x31   : > { %1065 = dma.done.wait (%p953_p11), [#allocation4], 16  }
  0x32   : > { %1067 = vsyncadd (%p953_p11), [#allocation4], 4294967280  ;;  %s331_s15 = sand.u32 1, %s1078_s28  }
  0x33   : > { %s1223_s20 = sshll.u32 %s331_s15, 5 }
  0x34   : > { %s333_s21 = scalar_lea.vmem [#allocation5], %s1223_s20 }
  0x35   : > { %337 = sfence }
  0x36   : > { %v370_v4 = vld [vmem:[%s333_s21 + $0x18] sm:$0xff]  ;;  %v369_v5 = vld [vmem:[%s333_s21 + $0x10] sm:$0xff]  ;;  %vm383_vm0 = vcmask 261120   ;;  %v365_v6 = vld [vmem:[%s1350_s2] sm:$0xff]  ;;  %v1089_v7 = vmov 0   ;;  %vm531_vm1 = vcmask 130048  }
  0x37   : > { %904 = vmatprep.subr.mxu0 %v370_v4  ;;  %993 = vset.pattern.permute.xlu0 %v1089_v7  ;;  %v368_v8 = vld [vmem:[%s333_s21 + $0x8] sm:$0xff]  ;;  %v367_v10 = vld [vmem:[%s333_s21] sm:$0xff]  ;;  %v639_v15 = vld [vmem:[%s1355_s7 + $0x10] sm:$0xff]  ;;  %s867_s25 = sld [smem:[#allocation2 + $0x1]]  ;;  %s364_s23 = scalar_lea.vmem [#allocation6], %s1223_s20 }
  0x38   : > { %905 = vmatpush3.msra.mxu0 %v370_v4  ;;  %912 = vmatprep.mubr.msk.f32.mxu0 %vm383_vm0, %v365_v6  ;;  %v372_v9 = vld [vmem:[%s1351_s3 + $0x8] sm:$0xff]  ;;  %v371_v11 = vld [vmem:[%s1351_s3] sm:$0xff]  ;;  %v510_v17 = vld [vmem:[%s1353_s5 + $0x18] sm:$0xff]  ;;  %s869_s26 = sld [smem:[#allocation2 + $0x3]]  ;;  %s775_s24 = sshll.u32 %s364_s23, 4  ;;  %s1298_s24 = int_to_ptr.vmem [resolvable:$true] %s775_s24 }
  0x39   : > { %906 = vmatprep.subr.mxu0 %v369_v5  ;;  %380 = vperm.xlu0 %993, %v372_v9   ;;  %v366_v12 = vld [vmem:[%s1350_s2 + $0x8] sm:$0xff]  ;;  %v637_v14 = vld [vmem:[%s1355_s7] sm:$0xff]  ;;  %v509_v18 = vld [vmem:[%s1353_s5 + $0x10] sm:$0xff]  ;;  %s871_s10 = sld [smem:[#allocation2 + $0x5]]  ;;  %p1362_p10 = scmp.ne.s32.totalorder %s1359_s16, 0 }
  0x3a   : > { %907 = vmatpush3.msra.mxu0 %v369_v5  ;;  %994 = vset.pattern.permute.xlu1 %v1089_v7  ;;  %v508_v13 = vld [vmem:[%s1353_s5 + $0x8] sm:$0xff]  ;;  %v503_v16 = vld [vmem:[%s1352_s4] sm:$0xff]  ;;  %v640_v21 = vld [vmem:[%s1355_s7 + $0x18] sm:$0xff]  ;;  %s467_s12 = sld [smem:[#allocation2]] }
  0x3b   : > { %908 = vmatprep.subr.mxu0 %v368_v8  ;;  %919 = vmatprep.mubr.msk.f32.mxu1 %vm531_vm1, %v503_v16  ;;  %v507_v19 = vld [vmem:[%s1353_s5] sm:$0xff]  ;;  %v638_v20 = vld [vmem:[%s1355_s7 + $0x8] sm:$0xff]  ;;  %s868_s13 = sld [smem:[#allocation2 + $0x2]]  ;;  %v505_v59 = vld [vmem:[%s1352_s4 + $0x10] sm:$0xff] }
  0x3c   : > { %909 = vmatpush3.msra.mxu0 %v368_v8  ;;  %528 = vperm.xlu1 %994, %v510_v17   ;;  %s870_s19 = sld [smem:[#allocation2 + $0x4]]  ;;  %v504_v58 = vld [vmem:[%s1352_s4 + $0x8] sm:$0xff]  ;;  %v506_v60 = vld [vmem:[%s1352_s4 + $0x18] sm:$0xff]  ;;  %v633_v61 = vld [vmem:[%s1354_s6] sm:$0xff] }
  0x3d   : > { %910 = vmatprep.subr.mxu0 %v367_v10  ;;  %375 = vperm.xlu0 %993, %v371_v11   ;;  %v469_v26 = vstv %s867_s25  ;;  %v636_v16 = vld [vmem:[%s1354_s6 + $0x18] sm:$0xff]  ;;  %s881_s25 = sshll.u32 %s1160_s9, 7  ;;  %s1307_s9 = scalar_lea.sflag [#allocation3], %s331_s15 }
  0x3e   : > { %911 = vmatpush3.msra.mxu0 %v367_v10  ;;  %v481_v27 = vstv %s869_s26 }
  0x3f   : > { %913 = vmatmul.mubr.msk.f32.vlgmr.msra.gmra.mxu0 %vm383_vm0, %v366_v12  ;;  %v493_v28 = vstv %s871_s10  ;;  %s1303_s10 = scalar_lea.hbm %s1356_s8, %s881_s25 }
  0x40   : > { %523 = vperm.xlu1 %994, %v509_v18   ;;  %v474_v39 = vstv %s467_s12  ;;  %s1022_s12 = scalar_lea.vmem %s1298_s24, 512 }
  0x41   : > { %518 = vperm.xlu0 %993, %v508_v13   ;;  %v486_v40 = vstv %s868_s13  ;;  %p1023_p5 = scmp.ne.s32.totalorder %s1298_s24, %s1022_s12  ;;  %s1090_s13 = smov [#allocation6]  }
  0x42   : > { %v498_v44 = vstv %s870_s19  ;;  %s1026_s19 = sshll.u32 %s1090_s13, 4  ;;  %s1027_s19 = int_to_ptr.vmem [resolvable:$false] %s1026_s19 }
  0x43   : > { %p1024_p11 = pnand %p1023_p5, %p1362_p10  ;;  %s1028_s21 = scalar_lea.vmem %s1027_s19, 1024 }
  0x44   : > { %513 = vperm.xlu1 %994, %v507_v19   ;;  %p1029_p13 = scmp.lt.s32.totalorder %s1298_s24, %s1027_s19  ;;  %p1030_p0 = scmp.lt.s32.totalorder %s1028_s21, %s1022_s12 }
  0x45   : > { %643 = vperm.xlu0 %993, %v637_v14   ;;  %v634_v14 = vld [vmem:[%s1354_s6 + $0x8] sm:$0xff]  ;;  %p1025_p12 = pneg %p1024_p11 }
  0x46   : > { %p1031_p1 = por %p1030_p0, %p1029_p13 }
  0x48   : > { %648 = vperm.xlu1 %994, %v638_v20   ;;  %p1032_p2 = pnand %p1031_p1, %p1025_p12 }
  0x49   : > { %653 = vperm.xlu0 %993, %v639_v15   ;;  %v635_v15 = vld [vmem:[%s1354_s6 + $0x10] sm:$0xff] }
  0x4c   : > { %658 = vperm.xlu1 %994, %v640_v21  }
  0xb4   : > { %v381_v22 = vpop.permute.xlu0 %380 }
  0xb7   : > { %v529_v62 = vpop.permute.xlu1 %528 }
  0xb8   : > { %v376_v25 = vpop.permute.xlu0 %375 }
  0xbb   : > { %v524_v0 = vpop.permute.xlu1 %523 }
  0xbc   : > { %v519_v4 = vpop.permute.xlu0 %518 }
  0xbf   : > { %v514_v9 = vpop.permute.xlu1 %513 }
  0xc0   : > { %v644_v18 = vpop.permute.xlu0 %643 }
  0xc3   : > { %v649_v17 = vpop.permute.xlu1 %648 }
  0xff   : > { %v914_v23 = vpop.f32.mrf.mxu0 }
 0x100   : > { %v462_v24 = vadd.f32 %v914_v23, %v381_v22  ;;  %v659_v23 = vpop.permute.xlu1 %658 }
 0x101   : > { %v456_v29 = vpop.f32.mrf.mxu0 }
 0x102   : > { %v466_v30 = vmax.f32 %v462_v24, 0.0  ;;  %v457_v31 = vadd.f32 %v456_v29, %v376_v25 }
 0x104   : > { %v471_v32 = vadd.f32 %v469_v26, %v466_v30  ;;  %v483_v33 = vadd.f32 %v481_v27, %v466_v30  ;;  %v495_v34 = vadd.f32 %v493_v28, %v466_v30  ;;  %v465_v35 = vmax.f32 %v457_v31, 0.0 }
 0x106   : > { %995 = vtanh.f32 %v471_v32  ;;  %v470_v36 = vadd.f32 %v469_v26, %v465_v35  ;;  %v482_v37 = vadd.f32 %v481_v27, %v465_v35  ;;  %v494_v38 = vadd.f32 %v493_v28, %v465_v35  ;;  %v654_v26 = vpop.permute.xlu0 %653 }
 0x107   : > { %997 = vtanh.f32 %v483_v33 }
 0x108   : > { %999 = vtanh.f32 %v495_v34 }
 0x109   : > { %1001 = vtanh.f32 %v470_v36 }
 0x10a   : > { %1003 = vtanh.f32 %v482_v37 }
 0x10b   : > { %1005 = vtanh.f32 %v494_v38 }
 0x113   : > { %v996_v41 = vpop.eup %995 }
 0x114   : > { %v998_v42 = vpop.eup %997  ;;  %v476_v43 = vmul.f32 %v996_v41, %v474_v39 }
 0x115   : > { %v1000_v45 = vpop.eup %999  ;;  %v488_v46 = vmul.f32 %v998_v42, %v486_v40 }
 0x116   : > { %v1002_v47 = vpop.eup %1001  ;;  %v500_v51 = vmul.f32 %v1000_v45, %v498_v44 }
 0x117   : > { %v1004_v48 = vpop.eup %1003  ;;  %v475_v49 = vmul.f32 %v1002_v47, %v474_v39  ;;  %v490_v50 = vadd.f32 %v488_v46, %v476_v43 }
 0x118   : > { %v1006_v52 = vpop.eup %1005  ;;  %v487_v53 = vmul.f32 %v1004_v48, %v486_v40 }
 0x119   : > { %v502_v54 = vadd.f32 %v500_v51, %v490_v50  ;;  %v499_v55 = vmul.f32 %v1006_v52, %v498_v44 }
 0x11a   : > { %v489_v56 = vadd.f32 %v487_v53, %v475_v49 }
 0x11b   : > { %915 = vmatprep.subr.mxu1 %v502_v54 }
 0x11c   : > { %916 = vmatpush3.msra.mxu1 %v502_v54  ;;  %v501_v57 = vadd.f32 %v499_v55, %v489_v56 }
 0x11e   : > { %917 = vmatprep.subr.mxu1 %v501_v57 }
 0x11f   : > { %918 = vmatpush3.msra.mxu1 %v501_v57 }
 0x120   : > { %920 = vmatmul.mubr.msk.f32.vlgmr.msra.gmra.mxu1 %vm531_vm1, %v504_v58 }
 0x121   : > { %922 = vmatprep.mubr.msk.f32.mxu1 %vm531_vm1, %v505_v59 }
 0x124   : > { %923 = vmatmul.mubr.msk.f32.gmra.mxu1 %vm531_vm1, %v506_v60 }
 0x125   : > { %933 = vmatprep.mubr.msk.f32.mxu1 %vm383_vm0, %v633_v61 }
 0x1e0   : > { %v921_v63 = vpop.f32.mrf.mxu1 }
 0x1e1   : > { %v616_v6 = vadd.f32 %v921_v63, %v519_v4 }
 0x1e2   : > { %v610_v1 = vpop.f32.mrf.mxu1 }
 0x1e3   : > { %v611_v10 = vadd.f32 %v610_v1, %v514_v9  ;;  %v630_v12 = vmax.f32 %v616_v6, 0.0 }
 0x1e4   : > { %v924_v2 = vpop.f32.mrf.mxu1 }
 0x1e5   : > { %v626_v3 = vadd.f32 %v924_v2, %v529_v62  ;;  %v629_v13 = vmax.f32 %v611_v10, 0.0 }
 0x1e6   : > { %v620_v5 = vpop.f32.mrf.mxu1 }
 0x1e7   : > { %v632_v7 = vmax.f32 %v626_v3, 0.0  ;;  %v621_v8 = vadd.f32 %v620_v5, %v524_v0 }
 0x1e9   : > { %v631_v11 = vmax.f32 %v621_v8, 0.0  ;;  %925 = vmatprep.subr.mxu1 %v632_v7 }
 0x1ea   : > { %926 = vmatpush3.msra.mxu1 %v632_v7 }
 0x1eb   : > { %927 = vmatprep.subr.mxu1 %v631_v11 }
 0x1ec   : > { %928 = vmatpush3.msra.mxu1 %v631_v11 }
 0x1ed   : > { %929 = vmatprep.subr.mxu1 %v630_v12 }
 0x1ee   : > { %930 = vmatpush3.msra.mxu1 %v630_v12 }
 0x1ef   : > { %931 = vmatprep.subr.mxu1 %v629_v13 }
 0x1f0   : > { %932 = vmatpush3.msra.mxu1 %v629_v13 }
 0x1f1   : > { %934 = vmatmul.mubr.msk.f32.vlgmr.msra.gmra.mxu1 %vm383_vm0, %v634_v14 }
 0x1f2   : > { %936 = vmatprep.mubr.msk.f32.mxu1 %vm383_vm0, %v635_v15 }
 0x1f5   : > { %937 = vmatmul.mubr.msk.f32.gmra.mxu1 %vm383_vm0, %v636_v16 }
 0x2b1   : > { %v935_v19 = vpop.f32.mrf.mxu1 }
 0x2b2   : > { %v745_v20 = vadd.f32 %v935_v19, %v649_v17 }
 0x2b3   : > { %v739_v21 = vpop.f32.mrf.mxu1 }
 0x2b4   : > { %759 = vst [vmem:[%s364_s23 + $0x8] sm:$0xff] %v745_v20  ;;  %v740_v22 = vadd.f32 %v739_v21, %v644_v18 }
 0x2b5   : > { %v938_v24 = vpop.f32.mrf.mxu1 }
 0x2b6   : > { %758 = vst [vmem:[%s364_s23] sm:$0xff] %v740_v22  ;;  %v755_v25 = vadd.f32 %v938_v24, %v659_v23 }
 0x2b7   : > { %v749_v27 = vpop.f32.mrf.mxu1 }
 0x2b8   : > { %761 = vst [vmem:[%s364_s23 + $0x18] sm:$0xff] %v755_v25  ;;  %v750_v28 = vadd.f32 %v749_v27, %v654_v26 }
 0x2ba   : > { %760 = vst [vmem:[%s364_s23 + $0x10] sm:$0xff] %v750_v28 }
 0x2bb   : > { %1035 = shalt.err (!%p1032_p2)
}
 0x2bc   : > { %s1036_s15 = scalar_lea.hbm %s1303_s10, 512  ;;  %s1040_s23 = scalar_lea.hbm %s1356_s8, 1024 }
 0x2bd   : > { %p1037_p3 = scmp.ne.s32.totalorder %s1303_s10, %s1036_s15  ;;  %p1041_p8 = scmp.lt.s32.totalorder %s1303_s10, %s1356_s8 }
 0x2be   : > { %p1042_p9 = scmp.lt.s32.totalorder %s1040_s23, %s1036_s15 }
 0x2bf   : > { %p1038_p4 = pnand %p1037_p3, %p1362_p10 }
 0x2c0   : > { %p1043_p5 = por %p1042_p9, %p1041_p8 }
 0x2c1   : > { %p1039_p7 = pneg %p1038_p4 }
 0x2c3   : > { %p1044_p11 = pnand %p1043_p5, %p1039_p7 }
 0x2c5   : > { %1047 = shalt.err (!%p1044_p11)
}
 0x2c6   : > { %s1091_s20 = smov 128   ;;  %s1092_s12 = smov 256  }
 0x2c7   : > { %s1093_s13 = smov 8  }
 0x2c8   : > { %943 = dma.vmem_to_hbm [thread:$0]  (%p1362_p10), %s1298_s24, 512, %s1303_s10, %s1307_s9, %s1091_s20, %s1092_s12, %s1093_s13  }
 0x2c9 PF: > { %s790_s19 = sand.u32 1, %s1074_s27   ;;  %p1363_p12 = scmp.ne.s32.totalorder %s1360_s17, 0 }
 0x2ca   : > { %s791_s21 = scalar_lea.sflag [#allocation3], %s790_s19 }
 0x2cb   : > { %p950_p13 = pnand %p858_p6, %p1363_p12 }
 0x2cd   : > { %p951_p0 = pneg %p950_p13 }
 0x2cf   : > { %1069 = dma.done.wait (%p951_p0), %s791_s21, 512  }
 0x2d0   : > { %1071 = vsyncadd (%p951_p0), %s791_s21, 4294966784  ;;  %p19_p1 = scmp.ge.s32.totalorder %s1164_s11, 4   ;;  %s1364_s27 = smov %s1078_s28 }
 0x2d1   : > { %s1365_s28 = smov %s1082_s29  ;;  %s1366_s29 = smov %s1176_s14 }
 0x2d2   : > { %s1367_s30 = smov %s1164_s11  ;;  %21 = sbr.rel (!%p19_p1) target bundleno = 4 (0x4), region = 135 }
 0x2d7   :  { %796 = vsyncpa [#allocation3], 1 }
 0x2d8   :  { %798 = vsyncpa [#allocation3 + $0x1], 1 }
 0x2d9   :  { %799 = vsyncpa [#allocation4], 1 }
 0x2da   :  { %801 = vsyncpa [#allocation4 + $0x1], 1 }

</bundles_post_ra>
